<compile_context>
chip_gen: v5e
topology: v5e:2x2
jax: 0.10.0
libtpu: 0.0.40
codegen_flags: <defaults>
</compile_context>

<pallas_src>
import functools
import math

import jax
import jax.numpy as jnp
import numpy as np
from jax.experimental import pallas as pl
from jax.experimental.pallas import tpu as pltpu

_LANE = 128
_INPUT_VMEM_BUDGET_BYTES = 16 * 1024 * 1024  # double-buffered input tiles live under this
_MAX_F_TILE = 64 * 1024                      # cap on lane-tile width
_PAD_LOGIT = -1e4                            # padded logits contribute exactly 0 to all sums


def _bce_dice_partial_kernel(*refs, num_preds):
    """Accumulate per-row partial sums for BCE-with-logits and dice terms.

    refs = (pred_ref_0, ..., pred_ref_{P-1}, target_ref, acc_ref)
      pred_ref_j, target_ref : (N, F_TILE) tiles
      acc_ref : (1, P, 4, N, 1) resident f32 accumulator (output block, constant over k)
                slot 0: sum(bce_elem), 1: sum(sigmoid*z), 2: sum(sigmoid), 3: sum(z) (j==0)
    """
    pred_refs = refs[:num_preds]
    target_ref = refs[num_preds]
    acc_ref = refs[num_preds + 1]

    k = pl.program_id(1)

    @pl.when(k == 0)
    def _init():
        acc_ref[...] = jnp.zeros_like(acc_ref)

    z = target_ref[...].astype(jnp.float32)                      # (N, Ft)
    acc_ref[0, 0, 3] += jnp.sum(z, axis=1, keepdims=True)        # target sums (shared)

    for j in range(num_preds):                                   # static unroll, P is small
        x = pred_refs[j][...].astype(jnp.float32)                # (N, Ft)
        e = jnp.exp(-jnp.abs(x))                                 # one transcendental, reused
        bce_elem = jnp.maximum(x, 0.0) - x * z + jnp.log1p(e)    # stable BCE-with-logits
        r = pl.reciprocal(1.0 + e, approx=True)                  # EUP approx reciprocal
        p_sig = jnp.where(x >= 0.0, r, e * r)                    # sigmoid(x) via shared e
        acc_ref[0, j, 0] += jnp.sum(bce_elem, axis=1, keepdims=True)
        acc_ref[0, j, 1] += jnp.sum(p_sig * z, axis=1, keepdims=True)
        acc_ref[0, j, 2] += jnp.sum(p_sig, axis=1, keepdims=True)


def _choose_tiling(num_inputs, n, f):
    """Pick (f_tile, num_parallel_chunks, tiles_per_chunk, padded_F)."""
    per_buf_elems = _INPUT_VMEM_BUDGET_BYTES // (2 * num_inputs * 4)
    f_tile = (per_buf_elems // max(n, 1)) // _LANE * _LANE
    f_tile = max(_LANE, min(f_tile, _MAX_F_TILE))
    if f <= f_tile:
        return f, 1, 1, f
    k_total = -(-f // f_tile)
    num_s = 2 if k_total >= 2 else 1          # 2-way split -> v7x megacore parallelism
    k2 = -(-k_total // num_s)
    return f_tile, num_s, k2, num_s * k2 * f_tile


def _bce_dice_partial_sums(preds, target):
    """Run the fused kernel; returns ((S, P, 4, N, 1) partial sums, true F)."""
    num_preds = len(preds)
    n = target.shape[0]
    f = math.prod(target.shape[1:])
    for pr in preds:
        if pr.shape != target.shape:
            raise ValueError("prediction / target shape mismatch")

    f_tile, num_s, k2, f_pad = _choose_tiling(num_preds + 1, n, f)

    preds2 = [jnp.reshape(pr, (n, f)) for pr in preds]
    tgt2 = jnp.reshape(target, (n, f))
    if f_pad != f:
        pad = f_pad - f
        # Pad values chosen so padded elements contribute exactly 0 to every partial sum.
        preds2 = [jnp.pad(pr, ((0, 0), (0, pad)), constant_values=_PAD_LOGIT)
                  for pr in preds2]
        tgt2 = jnp.pad(tgt2, ((0, 0), (0, pad)), constant_values=0.0)

    def idx_map(s, k):
        return (0, s * k2 + k)

    kernel = functools.partial(_bce_dice_partial_kernel, num_preds=num_preds)

    acc = pl.pallas_call(
        kernel,
        out_shape=jax.ShapeDtypeStruct((num_s, num_preds, 4, n, 1), jnp.float32),
        grid_spec=pltpu.PrefetchScalarGridSpec(
            num_scalar_prefetch=0,
            grid=(num_s, k2),
            in_specs=[pl.BlockSpec((n, f_tile), idx_map)
                      for _ in range(num_preds + 1)],
            out_specs=pl.BlockSpec((1, num_preds, 4, n, 1),
                                   lambda s, k: (s, 0, 0, 0, 0)),
        ),
        compiler_params=pltpu.CompilerParams(
            dimension_semantics=("parallel", "arbitrary"),
            vmem_limit_bytes=48 * 1024 * 1024,
        ),
    )(*preds2, tgt2)
    return acc, f


@functools.partial(jax.jit, static_argnames=("wb", "wd"))
def gt_bce_dice_loss(main_output, aux_outputs, target, wb=1.0, wd=1.0):
    preds = (main_output,) if aux_outputs is None else (main_output,) + tuple(aux_outputs)
    num_preds = len(preds)
    n = target.shape[0]

    acc, f = _bce_dice_partial_sums(preds, target)        # (S, P, 4, N, 1)
    acc = jnp.sum(acc, axis=0)[..., 0]                    # combine parallel chunks -> (P, 4, N)

    bce_rows = acc[:, 0]                                  # (P, N) per-row BCE sums
    inter = acc[:, 1]                                     # (P, N) sum(sigmoid * z)
    psum = acc[:, 2]                                      # (P, N) sum(sigmoid)
    zsum = acc[0, 3]                                      # (N,)   sum(z), shared by all preds

    bce_per_pred = jnp.sum(bce_rows, axis=1) / (n * f)    # BCEWithLogits mean reduction
    dice_rows = 1.0 - (2.0 * inter + 1.0) / (psum + zsum[None, :] + 1.0)
    dice_per_pred = jnp.mean(dice_rows, axis=1)           # dice loss, batch mean

    w = jnp.asarray([1.0] + [0.4] * (num_preds - 1), dtype=jnp.float32)
    bce_total = jnp.sum(w * bce_per_pred)
    dice_total = jnp.sum(w * dice_per_pred)
    return wb * bce_total + wd * dice_total


def _reference_loss(main_output, aux_outputs, target, wb=1.0, wd=1.0):
    """Pure-JAX reference matching the PyTorch GT_BceDiceLoss."""
    def bce(x, z):
        return jnp.mean(jnp.maximum(x, 0.0) - x * z + jnp.log1p(jnp.exp(-jnp.abs(x))))

    def dice(x, z):
        p = jax.nn.sigmoid(x)
        n = x.shape[0]
        pf, zf = p.reshape(n, -1), z.reshape(n, -1)
        inter = jnp.sum(pf * zf, axis=1)
        union = jnp.sum(pf, axis=1) + jnp.sum(zf, axis=1)
        return jnp.mean(1.0 - (2.0 * inter + 1.0) / (union + 1.0))

    b, d = bce(main_output, target), dice(main_output, target)
    if aux_outputs is not None:
        b = b + 0.4 * sum(bce(a, target) for a in aux_outputs)
        d = d + 0.4 * sum(dice(a, target) for a in aux_outputs)
    return wb * b + wd * d


if __name__ == "__main__":
    key = jax.random.PRNGKey(0)
    k1, k2, k3, k4, k5, k6 = jax.random.split(key, 6)

    # Small case (single-tile path): main + 2 aux outputs, NCHW binary-segmentation logits.
    B, C, H, W = 2, 1, 16, 16
    main_output = jax.random.normal(k1, (B, C, H, W), dtype=jnp.float32)
    aux_outputs = (
        jax.random.normal(k2, (B, C, H, W), dtype=jnp.float32),
        jax.random.normal(k3, (B, C, H, W), dtype=jnp.float32),
    )
    target = (jax.random.uniform(k4, (B, C, H, W)) > 0.5).astype(jnp.float32)

    loss = gt_bce_dice_loss(main_output, aux_outputs, target, wb=1.0, wd=1.0)
    jax.block_until_ready(loss)
    np.testing.assert_allclose(
        np.asarray(loss),
        np.asarray(_reference_loss(main_output, aux_outputs, target)),
        rtol=2e-2, atol=2e-2)

    # aux_outputs is None path.
    loss_no_aux = gt_bce_dice_loss(main_output, None, target)
    jax.block_until_ready(loss_no_aux)
    np.testing.assert_allclose(
        np.asarray(loss_no_aux),
        np.asarray(_reference_loss(main_output, None, target)),
        rtol=2e-2, atol=2e-2)

    # Larger case exercising the tiled / padded / 2-way-parallel reduction path.
    B2, C2, H2, W2 = 2, 1, 500, 500
    big_main = jax.random.normal(k5, (B2, C2, H2, W2), dtype=jnp.float32)
    big_tgt = (jax.random.uniform(k6, (B2, C2, H2, W2)) > 0.5).astype(jnp.float32)
    big_aux = (0.5 * big_main + 0.1,)
    big_loss = gt_bce_dice_loss(big_main, big_aux, big_tgt)
    jax.block_until_ready(big_loss)
    np.testing.assert_allclose(
        np.asarray(big_loss),
        np.asarray(_reference_loss(big_main, big_aux, big_tgt)),
        rtol=2e-2, atol=2e-2)

    print("KERNEL_OK")
</pallas_src>

<mosaic_0001>
module attributes {stable_mosaic.version = 11 : i64} {
  func.func @_bce_dice_partial_kernel(%arg0: i32, %arg1: i32, %arg2: memref<2x256xf32, #tpu.memory_space<vmem>>, %arg3: memref<2x256xf32, #tpu.memory_space<vmem>>, %arg4: memref<2x256xf32, #tpu.memory_space<vmem>>, %arg5: memref<2x256xf32, #tpu.memory_space<vmem>>, %arg6: memref<1x3x4x2x1xf32, #tpu.memory_space<vmem>>) attributes {dimension_semantics = [#tpu.dimension_semantics<parallel>, #tpu.dimension_semantics<arbitrary>], iteration_bounds = array<i64: 1, 1>, scalar_prefetch = 0 : i64, scratch_operands = 0 : i64, tpu.core_type = #tpu.core_type<tc>, window_params = [{transform_indices = @transform_0, window_bounds = array<i64: 2, 256>}, {transform_indices = @transform_1, window_bounds = array<i64: 2, 256>}, {transform_indices = @transform_2, window_bounds = array<i64: 2, 256>}, {transform_indices = @transform_3, window_bounds = array<i64: 2, 256>}, {transform_indices = @transform_4, window_bounds = array<i64: 1, 3, 4, 2, 1>}]} {
    %c0_i32 = arith.constant 0 : i32
    %0 = arith.cmpi eq, %arg1, %c0_i32 : i32
    %1 = arith.extui %0 : i1 to i32
    %c0_i32_0 = arith.constant 0 : i32
    %2 = arith.cmpi ne, %1, %c0_i32_0 : i32
    scf.if %2 {
      %cst_126 = arith.constant 0.000000e+00 : f32
      %141 = vector.broadcast %cst_126 : f32 to vector<1x3x4x2x1xf32>
      %c0_127 = arith.constant 0 : index
      %c0_128 = arith.constant 0 : index
      %c0_129 = arith.constant 0 : index
      %c0_130 = arith.constant 0 : index
      %c0_131 = arith.constant 0 : index
      %142 = vector.load %arg6[%c0_127, %c0_128, %c0_129, %c0_130, %c0_131] : memref<1x3x4x2x1xf32, #tpu.memory_space<vmem>>, vector<1x3x4x2x1xf32>
      tpu.vector_store %arg6[%c0_127, %c0_128, %c0_129, %c0_130, %c0_131], %141 {strides = array<i32>} : memref<1x3x4x2x1xf32, #tpu.memory_space<vmem>>, vector<1x3x4x2x1xf32>,
    } else {
    }
    %c0 = arith.constant 0 : index
    %c0_1 = arith.constant 0 : index
    %3 = vector.load %arg5[%c0, %c0_1] : memref<2x256xf32, #tpu.memory_space<vmem>>, vector<2x256xf32>
    %c0_2 = arith.constant 0 : index
    %c0_3 = arith.constant 0 : index
    %c3 = arith.constant 3 : index
    %c0_4 = arith.constant 0 : index
    %c0_5 = arith.constant 0 : index
    %4 = vector.load %arg6[%c0_2, %c0_3, %c3, %c0_4, %c0_5] : memref<1x3x4x2x1xf32, #tpu.memory_space<vmem>>, vector<1x1x1x2x1xf32>
    %5 = vector.shape_cast %4 : vector<1x1x1x2x1xf32> to vector<2x1xf32>
    %cst = arith.constant dense<0.000000e+00> : vector<2xf32>
    %6 = vector.multi_reduction <add>, %3, %cst [1] : vector<2x256xf32> to vector<2xf32>
    %7 = vector.shape_cast %6 : vector<2xf32> to vector<2x1xf32>
    %8 = arith.addf %5, %7 : vector<2x1xf32>
    %c0_6 = arith.constant 0 : index
    %c0_7 = arith.constant 0 : index
    %c3_8 = arith.constant 3 : index
    %c0_9 = arith.constant 0 : index
    %c0_10 = arith.constant 0 : index
    %9 = vector.load %arg6[%c0_6, %c0_7, %c3_8, %c0_9, %c0_10] : memref<1x3x4x2x1xf32, #tpu.memory_space<vmem>>, vector<1x1x1x2x1xf32>
    %10 = vector.shape_cast %9 : vector<1x1x1x2x1xf32> to vector<2x1xf32>
    %11 = vector.shape_cast %8 : vector<2x1xf32> to vector<1x1x1x2x1xf32>
    tpu.vector_store %arg6[%c0_6, %c0_7, %c3_8, %c0_9, %c0_10], %11 {strides = array<i32>} : memref<1x3x4x2x1xf32, #tpu.memory_space<vmem>>, vector<1x1x1x2x1xf32>,
    %c0_11 = arith.constant 0 : index
    %c0_12 = arith.constant 0 : index
    %12 = vector.load %arg2[%c0_11, %c0_12] : memref<2x256xf32, #tpu.memory_space<vmem>>, vector<2x256xf32>
    %13 = math.absf %12 : vector<2x256xf32>
    %cst_13 = arith.constant 0.000000e+00 : f32
    %14 = vector.broadcast %cst_13 : f32 to vector<2x256xf32>
    %15 = arith.subf %14, %13 : vector<2x256xf32>
    %16 = math.exp %15 : vector<2x256xf32>
    %cst_14 = arith.constant 0.000000e+00 : f32
    %17 = vector.broadcast %cst_14 : f32 to vector<2x256xf32>
    %18 = arith.maximumf %12, %17 : vector<2x256xf32>
    %19 = arith.mulf %12, %3 : vector<2x256xf32>
    %20 = arith.subf %18, %19 : vector<2x256xf32>
    %21 = math.log1p %16 : vector<2x256xf32>
    %22 = arith.addf %20, %21 : vector<2x256xf32>
    %cst_15 = arith.constant 1.000000e+00 : f32
    %23 = vector.broadcast %cst_15 : f32 to vector<2x256xf32>
    %24 = arith.addf %23, %16 : vector<2x256xf32>
    %25 = tpu.reciprocal %24 {approx = true} : vector<2x256xf32> -> vector<2x256xf32>
    %cst_16 = arith.constant 0.000000e+00 : f32
    %26 = vector.broadcast %cst_16 : f32 to vector<2x256xf32>
    %27 = arith.cmpf oge, %12, %26 : vector<2x256xf32>
    %28 = arith.mulf %16, %25 : vector<2x256xf32>
    %29 = arith.select %27, %25, %28 : vector<2x256xi1>, vector<2x256xf32>
    %c0_17 = arith.constant 0 : index
    %c0_18 = arith.constant 0 : index
    %c0_19 = arith.constant 0 : index
    %c0_20 = arith.constant 0 : index
    %c0_21 = arith.constant 0 : index
    %30 = vector.load %arg6[%c0_17, %c0_18, %c0_19, %c0_20, %c0_21] : memref<1x3x4x2x1xf32, #tpu.memory_space<vmem>>, vector<1x1x1x2x1xf32>
    %31 = vector.shape_cast %30 : vector<1x1x1x2x1xf32> to vector<2x1xf32>
    %cst_22 = arith.constant dense<0.000000e+00> : vector<2xf32>
    %32 = vector.multi_reduction <add>, %22, %cst_22 [1] : vector<2x256xf32> to vector<2xf32>
    %33 = vector.shape_cast %32 : vector<2xf32> to vector<2x1xf32>
    %34 = arith.addf %31, %33 : vector<2x1xf32>
    %c0_23 = arith.constant 0 : index
    %c0_24 = arith.constant 0 : index
    %c0_25 = arith.constant 0 : index
    %c0_26 = arith.constant 0 : index
    %c0_27 = arith.constant 0 : index
    %35 = vector.load %arg6[%c0_23, %c0_24, %c0_25, %c0_26, %c0_27] : memref<1x3x4x2x1xf32, #tpu.memory_space<vmem>>, vector<1x1x1x2x1xf32>
    %36 = vector.shape_cast %35 : vector<1x1x1x2x1xf32> to vector<2x1xf32>
    %37 = vector.shape_cast %34 : vector<2x1xf32> to vector<1x1x1x2x1xf32>
    tpu.vector_store %arg6[%c0_23, %c0_24, %c0_25, %c0_26, %c0_27], %37 {strides = array<i32>} : memref<1x3x4x2x1xf32, #tpu.memory_space<vmem>>, vector<1x1x1x2x1xf32>,
    %c0_28 = arith.constant 0 : index
    %c0_29 = arith.constant 0 : index
    %c1 = arith.constant 1 : index
    %c0_30 = arith.constant 0 : index
    %c0_31 = arith.constant 0 : index
    %38 = vector.load %arg6[%c0_28, %c0_29, %c1, %c0_30, %c0_31] : memref<1x3x4x2x1xf32, #tpu.memory_space<vmem>>, vector<1x1x1x2x1xf32>
    %39 = vector.shape_cast %38 : vector<1x1x1x2x1xf32> to vector<2x1xf32>
    %40 = arith.mulf %29, %3 : vector<2x256xf32>
    %cst_32 = arith.constant dense<0.000000e+00> : vector<2xf32>
    %41 = vector.multi_reduction <add>, %40, %cst_32 [1] : vector<2x256xf32> to vector<2xf32>
    %42 = vector.shape_cast %41 : vector<2xf32> to vector<2x1xf32>
    %43 = arith.addf %39, %42 : vector<2x1xf32>
    %c0_33 = arith.constant 0 : index
    %c0_34 = arith.constant 0 : index
    %c1_35 = arith.constant 1 : index
    %c0_36 = arith.constant 0 : index
    %c0_37 = arith.constant 0 : index
    %44 = vector.load %arg6[%c0_33, %c0_34, %c1_35, %c0_36, %c0_37] : memref<1x3x4x2x1xf32, #tpu.memory_space<vmem>>, vector<1x1x1x2x1xf32>
    %45 = vector.shape_cast %44 : vector<1x1x1x2x1xf32> to vector<2x1xf32>
    %46 = vector.shape_cast %43 : vector<2x1xf32> to vector<1x1x1x2x1xf32>
    tpu.vector_store %arg6[%c0_33, %c0_34, %c1_35, %c0_36, %c0_37], %46 {strides = array<i32>} : memref<1x3x4x2x1xf32, #tpu.memory_space<vmem>>, vector<1x1x1x2x1xf32>,
    %c0_38 = arith.constant 0 : index
    %c0_39 = arith.constant 0 : index
    %c2 = arith.constant 2 : index
    %c0_40 = arith.constant 0 : index
    %c0_41 = arith.constant 0 : index
    %47 = vector.load %arg6[%c0_38, %c0_39, %c2, %c0_40, %c0_41] : memref<1x3x4x2x1xf32, #tpu.memory_space<vmem>>, vector<1x1x1x2x1xf32>
    %48 = vector.shape_cast %47 : vector<1x1x1x2x1xf32> to vector<2x1xf32>
    %cst_42 = arith.constant dense<0.000000e+00> : vector<2xf32>
    %49 = vector.multi_reduction <add>, %29, %cst_42 [1] : vector<2x256xf32> to vector<2xf32>
    %50 = vector.shape_cast %49 : vector<2xf32> to vector<2x1xf32>
    %51 = arith.addf %48, %50 : vector<2x1xf32>
    %c0_43 = arith.constant 0 : index
    %c0_44 = arith.constant 0 : index
    %c2_45 = arith.constant 2 : index
    %c0_46 = arith.constant 0 : index
    %c0_47 = arith.constant 0 : index
    %52 = vector.load %arg6[%c0_43, %c0_44, %c2_45, %c0_46, %c0_47] : memref<1x3x4x2x1xf32, #tpu.memory_space<vmem>>, vector<1x1x1x2x1xf32>
    %53 = vector.shape_cast %52 : vector<1x1x1x2x1xf32> to vector<2x1xf32>
    %54 = vector.shape_cast %51 : vector<2x1xf32> to vector<1x1x1x2x1xf32>
    tpu.vector_store %arg6[%c0_43, %c0_44, %c2_45, %c0_46, %c0_47], %54 {strides = array<i32>} : memref<1x3x4x2x1xf32, #tpu.memory_space<vmem>>, vector<1x1x1x2x1xf32>,
    %c0_48 = arith.constant 0 : index
    %c0_49 = arith.constant 0 : index
    %55 = vector.load %arg3[%c0_48, %c0_49] : memref<2x256xf32, #tpu.memory_space<vmem>>, vector<2x256xf32>
    %56 = math.absf %55 : vector<2x256xf32>
    %cst_50 = arith.constant 0.000000e+00 : f32
    %57 = vector.broadcast %cst_50 : f32 to vector<2x256xf32>
    %58 = arith.subf %57, %56 : vector<2x256xf32>
    %59 = math.exp %58 : vector<2x256xf32>
    %cst_51 = arith.constant 0.000000e+00 : f32
    %60 = vector.broadcast %cst_51 : f32 to vector<2x256xf32>
    %61 = arith.maximumf %55, %60 : vector<2x256xf32>
    %62 = arith.mulf %55, %3 : vector<2x256xf32>
    %63 = arith.subf %61, %62 : vector<2x256xf32>
    %64 = math.log1p %59 : vector<2x256xf32>
    %65 = arith.addf %63, %64 : vector<2x256xf32>
    %cst_52 = arith.constant 1.000000e+00 : f32
    %66 = vector.broadcast %cst_52 : f32 to vector<2x256xf32>
    %67 = arith.addf %66, %59 : vector<2x256xf32>
    %68 = tpu.reciprocal %67 {approx = true} : vector<2x256xf32> -> vector<2x256xf32>
    %cst_53 = arith.constant 0.000000e+00 : f32
    %69 = vector.broadcast %cst_53 : f32 to vector<2x256xf32>
    %70 = arith.cmpf oge, %55, %69 : vector<2x256xf32>
    %71 = arith.mulf %59, %68 : vector<2x256xf32>
    %72 = arith.select %70, %68, %71 : vector<2x256xi1>, vector<2x256xf32>
    %c0_54 = arith.constant 0 : index
    %c1_55 = arith.constant 1 : index
    %c0_56 = arith.constant 0 : index
    %c0_57 = arith.constant 0 : index
    %c0_58 = arith.constant 0 : index
    %73 = vector.load %arg6[%c0_54, %c1_55, %c0_56, %c0_57, %c0_58] : memref<1x3x4x2x1xf32, #tpu.memory_space<vmem>>, vector<1x1x1x2x1xf32>
    %74 = vector.shape_cast %73 : vector<1x1x1x2x1xf32> to vector<2x1xf32>
    %cst_59 = arith.constant dense<0.000000e+00> : vector<2xf32>
    %75 = vector.multi_reduction <add>, %65, %cst_59 [1] : vector<2x256xf32> to vector<2xf32>
    %76 = vector.shape_cast %75 : vector<2xf32> to vector<2x1xf32>
    %77 = arith.addf %74, %76 : vector<2x1xf32>
    %c0_60 = arith.constant 0 : index
    %c1_61 = arith.constant 1 : index
    %c0_62 = arith.constant 0 : index
    %c0_63 = arith.constant 0 : index
    %c0_64 = arith.constant 0 : index
    %78 = vector.load %arg6[%c0_60, %c1_61, %c0_62, %c0_63, %c0_64] : memref<1x3x4x2x1xf32, #tpu.memory_space<vmem>>, vector<1x1x1x2x1xf32>
    %79 = vector.shape_cast %78 : vector<1x1x1x2x1xf32> to vector<2x1xf32>
    %80 = vector.shape_cast %77 : vector<2x1xf32> to vector<1x1x1x2x1xf32>
    tpu.vector_store %arg6[%c0_60, %c1_61, %c0_62, %c0_63, %c0_64], %80 {strides = array<i32>} : memref<1x3x4x2x1xf32, #tpu.memory_space<vmem>>, vector<1x1x1x2x1xf32>,
    %c0_65 = arith.constant 0 : index
    %c1_66 = arith.constant 1 : index
    %c1_67 = arith.constant 1 : index
    %c0_68 = arith.constant 0 : index
    %c0_69 = arith.constant 0 : index
    %81 = vector.load %arg6[%c0_65, %c1_66, %c1_67, %c0_68, %c0_69] : memref<1x3x4x2x1xf32, #tpu.memory_space<vmem>>, vector<1x1x1x2x1xf32>
    %82 = vector.shape_cast %81 : vector<1x1x1x2x1xf32> to vector<2x1xf32>
    %83 = arith.mulf %72, %3 : vector<2x256xf32>
    %cst_70 = arith.constant dense<0.000000e+00> : vector<2xf32>
    %84 = vector.multi_reduction <add>, %83, %cst_70 [1] : vector<2x256xf32> to vector<2xf32>
    %85 = vector.shape_cast %84 : vector<2xf32> to vector<2x1xf32>
    %86 = arith.addf %82, %85 : vector<2x1xf32>
    %c0_71 = arith.constant 0 : index
    %c1_72 = arith.constant 1 : index
    %c1_73 = arith.constant 1 : index
    %c0_74 = arith.constant 0 : index
    %c0_75 = arith.constant 0 : index
    %87 = vector.load %arg6[%c0_71, %c1_72, %c1_73, %c0_74, %c0_75] : memref<1x3x4x2x1xf32, #tpu.memory_space<vmem>>, vector<1x1x1x2x1xf32>
    %88 = vector.shape_cast %87 : vector<1x1x1x2x1xf32> to vector<2x1xf32>
    %89 = vector.shape_cast %86 : vector<2x1xf32> to vector<1x1x1x2x1xf32>
    tpu.vector_store %arg6[%c0_71, %c1_72, %c1_73, %c0_74, %c0_75], %89 {strides = array<i32>} : memref<1x3x4x2x1xf32, #tpu.memory_space<vmem>>, vector<1x1x1x2x1xf32>,
    %c0_76 = arith.constant 0 : index
    %c1_77 = arith.constant 1 : index
    %c2_78 = arith.constant 2 : index
    %c0_79 = arith.constant 0 : index
    %c0_80 = arith.constant 0 : index
    %90 = vector.load %arg6[%c0_76, %c1_77, %c2_78, %c0_79, %c0_80] : memref<1x3x4x2x1xf32, #tpu.memory_space<vmem>>, vector<1x1x1x2x1xf32>
    %91 = vector.shape_cast %90 : vector<1x1x1x2x1xf32> to vector<2x1xf32>
    %cst_81 = arith.constant dense<0.000000e+00> : vector<2xf32>
    %92 = vector.multi_reduction <add>, %72, %cst_81 [1] : vector<2x256xf32> to vector<2xf32>
    %93 = vector.shape_cast %92 : vector<2xf32> to vector<2x1xf32>
    %94 = arith.addf %91, %93 : vector<2x1xf32>
    %c0_82 = arith.constant 0 : index
    %c1_83 = arith.constant 1 : index
    %c2_84 = arith.constant 2 : index
    %c0_85 = arith.constant 0 : index
    %c0_86 = arith.constant 0 : index
    %95 = vector.load %arg6[%c0_82, %c1_83, %c2_84, %c0_85, %c0_86] : memref<1x3x4x2x1xf32, #tpu.memory_space<vmem>>, vector<1x1x1x2x1xf32>
    %96 = vector.shape_cast %95 : vector<1x1x1x2x1xf32> to vector<2x1xf32>
    %97 = vector.shape_cast %94 : vector<2x1xf32> to vector<1x1x1x2x1xf32>
    tpu.vector_store %arg6[%c0_82, %c1_83, %c2_84, %c0_85, %c0_86], %97 {strides = array<i32>} : memref<1x3x4x2x1xf32, #tpu.memory_space<vmem>>, vector<1x1x1x2x1xf32>,
    %c0_87 = arith.constant 0 : index
    %c0_88 = arith.constant 0 : index
    %98 = vector.load %arg4[%c0_87, %c0_88] : memref<2x256xf32, #tpu.memory_space<vmem>>, vector<2x256xf32>
    %99 = math.absf %98 : vector<2x256xf32>
    %cst_89 = arith.constant 0.000000e+00 : f32
    %100 = vector.broadcast %cst_89 : f32 to vector<2x256xf32>
    %101 = arith.subf %100, %99 : vector<2x256xf32>
    %102 = math.exp %101 : vector<2x256xf32>
    %cst_90 = arith.constant 0.000000e+00 : f32
    %103 = vector.broadcast %cst_90 : f32 to vector<2x256xf32>
    %104 = arith.maximumf %98, %103 : vector<2x256xf32>
    %105 = arith.mulf %98, %3 : vector<2x256xf32>
    %106 = arith.subf %104, %105 : vector<2x256xf32>
    %107 = math.log1p %102 : vector<2x256xf32>
    %108 = arith.addf %106, %107 : vector<2x256xf32>
    %cst_91 = arith.constant 1.000000e+00 : f32
    %109 = vector.broadcast %cst_91 : f32 to vector<2x256xf32>
    %110 = arith.addf %109, %102 : vector<2x256xf32>
    %111 = tpu.reciprocal %110 {approx = true} : vector<2x256xf32> -> vector<2x256xf32>
    %cst_92 = arith.constant 0.000000e+00 : f32
    %112 = vector.broadcast %cst_92 : f32 to vector<2x256xf32>
    %113 = arith.cmpf oge, %98, %112 : vector<2x256xf32>
    %114 = arith.mulf %102, %111 : vector<2x256xf32>
    %115 = arith.select %113, %111, %114 : vector<2x256xi1>, vector<2x256xf32>
    %c0_93 = arith.constant 0 : index
    %c2_94 = arith.constant 2 : index
    %c0_95 = arith.constant 0 : index
    %c0_96 = arith.constant 0 : index
    %c0_97 = arith.constant 0 : index
    %116 = vector.load %arg6[%c0_93, %c2_94, %c0_95, %c0_96, %c0_97] : memref<1x3x4x2x1xf32, #tpu.memory_space<vmem>>, vector<1x1x1x2x1xf32>
    %117 = vector.shape_cast %116 : vector<1x1x1x2x1xf32> to vector<2x1xf32>
    %cst_98 = arith.constant dense<0.000000e+00> : vector<2xf32>
    %118 = vector.multi_reduction <add>, %108, %cst_98 [1] : vector<2x256xf32> to vector<2xf32>
    %119 = vector.shape_cast %118 : vector<2xf32> to vector<2x1xf32>
    %120 = arith.addf %117, %119 : vector<2x1xf32>
    %c0_99 = arith.constant 0 : index
    %c2_100 = arith.constant 2 : index
    %c0_101 = arith.constant 0 : index
    %c0_102 = arith.constant 0 : index
    %c0_103 = arith.constant 0 : index
    %121 = vector.load %arg6[%c0_99, %c2_100, %c0_101, %c0_102, %c0_103] : memref<1x3x4x2x1xf32, #tpu.memory_space<vmem>>, vector<1x1x1x2x1xf32>
    %122 = vector.shape_cast %121 : vector<1x1x1x2x1xf32> to vector<2x1xf32>
    %123 = vector.shape_cast %120 : vector<2x1xf32> to vector<1x1x1x2x1xf32>
    tpu.vector_store %arg6[%c0_99, %c2_100, %c0_101, %c0_102, %c0_103], %123 {strides = array<i32>} : memref<1x3x4x2x1xf32, #tpu.memory_space<vmem>>, vector<1x1x1x2x1xf32>,
    %c0_104 = arith.constant 0 : index
    %c2_105 = arith.constant 2 : index
    %c1_106 = arith.constant 1 : index
    %c0_107 = arith.constant 0 : index
    %c0_108 = arith.constant 0 : index
    %124 = vector.load %arg6[%c0_104, %c2_105, %c1_106, %c0_107, %c0_108] : memref<1x3x4x2x1xf32, #tpu.memory_space<vmem>>, vector<1x1x1x2x1xf32>
    %125 = vector.shape_cast %124 : vector<1x1x1x2x1xf32> to vector<2x1xf32>
    %126 = arith.mulf %115, %3 : vector<2x256xf32>
    %cst_109 = arith.constant dense<0.000000e+00> : vector<2xf32>
    %127 = vector.multi_reduction <add>, %126, %cst_109 [1] : vector<2x256xf32> to vector<2xf32>
    %128 = vector.shape_cast %127 : vector<2xf32> to vector<2x1xf32>
    %129 = arith.addf %125, %128 : vector<2x1xf32>
    %c0_110 = arith.constant 0 : index
    %c2_111 = arith.constant 2 : index
    %c1_112 = arith.constant 1 : index
    %c0_113 = arith.constant 0 : index
    %c0_114 = arith.constant 0 : index
    %130 = vector.load %arg6[%c0_110, %c2_111, %c1_112, %c0_113, %c0_114] : memref<1x3x4x2x1xf32, #tpu.memory_space<vmem>>, vector<1x1x1x2x1xf32>
    %131 = vector.shape_cast %130 : vector<1x1x1x2x1xf32> to vector<2x1xf32>
    %132 = vector.shape_cast %129 : vector<2x1xf32> to vector<1x1x1x2x1xf32>
    tpu.vector_store %arg6[%c0_110, %c2_111, %c1_112, %c0_113, %c0_114], %132 {strides = array<i32>} : memref<1x3x4x2x1xf32, #tpu.memory_space<vmem>>, vector<1x1x1x2x1xf32>,
    %c0_115 = arith.constant 0 : index
    %c2_116 = arith.constant 2 : index
    %c2_117 = arith.constant 2 : index
    %c0_118 = arith.constant 0 : index
    %c0_119 = arith.constant 0 : index
    %133 = vector.load %arg6[%c0_115, %c2_116, %c2_117, %c0_118, %c0_119] : memref<1x3x4x2x1xf32, #tpu.memory_space<vmem>>, vector<1x1x1x2x1xf32>
    %134 = vector.shape_cast %133 : vector<1x1x1x2x1xf32> to vector<2x1xf32>
    %cst_120 = arith.constant dense<0.000000e+00> : vector<2xf32>
    %135 = vector.multi_reduction <add>, %115, %cst_120 [1] : vector<2x256xf32> to vector<2xf32>
    %136 = vector.shape_cast %135 : vector<2xf32> to vector<2x1xf32>
    %137 = arith.addf %134, %136 : vector<2x1xf32>
    %c0_121 = arith.constant 0 : index
    %c2_122 = arith.constant 2 : index
    %c2_123 = arith.constant 2 : index
    %c0_124 = arith.constant 0 : index
    %c0_125 = arith.constant 0 : index
    %138 = vector.load %arg6[%c0_121, %c2_122, %c2_123, %c0_124, %c0_125] : memref<1x3x4x2x1xf32, #tpu.memory_space<vmem>>, vector<1x1x1x2x1xf32>
    %139 = vector.shape_cast %138 : vector<1x1x1x2x1xf32> to vector<2x1xf32>
    %140 = vector.shape_cast %137 : vector<2x1xf32> to vector<1x1x1x2x1xf32>
    tpu.vector_store %arg6[%c0_121, %c2_122, %c2_123, %c0_124, %c0_125], %140 {strides = array<i32>} : memref<1x3x4x2x1xf32, #tpu.memory_space<vmem>>, vector<1x1x1x2x1xf32>,
    return
  }
  func.func @transform_0(%arg0: i32, %arg1: i32) -> (i32, i32) {
    %c1_i32 = arith.constant 1 : i32
    %0 = arith.muli %arg0, %c1_i32 : i32
    %1 = arith.addi %0, %arg1 : i32
    %c0_i32 = arith.constant 0 : i32
    %c0_i32_0 = arith.constant 0 : i32
    return %c0_i32, %1 : i32, i32
  }
  func.func @transform_1(%arg0: i32, %arg1: i32) -> (i32, i32) {
    %c1_i32 = arith.constant 1 : i32
    %0 = arith.muli %arg0, %c1_i32 : i32
    %1 = arith.addi %0, %arg1 : i32
    %c0_i32 = arith.constant 0 : i32
    %c0_i32_0 = arith.constant 0 : i32
    return %c0_i32, %1 : i32, i32
  }
  func.func @transform_2(%arg0: i32, %arg1: i32) -> (i32, i32) {
    %c1_i32 = arith.constant 1 : i32
    %0 = arith.muli %arg0, %c1_i32 : i32
    %1 = arith.addi %0, %arg1 : i32
    %c0_i32 = arith.constant 0 : i32
    %c0_i32_0 = arith.constant 0 : i32
    return %c0_i32, %1 : i32, i32
  }
  func.func @transform_3(%arg0: i32, %arg1: i32) -> (i32, i32) {
    %c1_i32 = arith.constant 1 : i32
    %0 = arith.muli %arg0, %c1_i32 : i32
    %1 = arith.addi %0, %arg1 : i32
    %c0_i32 = arith.constant 0 : i32
    %c0_i32_0 = arith.constant 0 : i32
    return %c0_i32, %1 : i32, i32
  }
  func.func @transform_4(%arg0: i32, %arg1: i32) -> (i32, i32, i32, i32, i32) {
    %c0_i32 = arith.constant 0 : i32
    %c0_i32_0 = arith.constant 0 : i32
    %c0_i32_1 = arith.constant 0 : i32
    %c0_i32_2 = arith.constant 0 : i32
    %c0_i32_3 = arith.constant 0 : i32
    return %arg0, %c0_i32, %c0_i32_0, %c0_i32_1, %c0_i32_2 : i32, i32, i32, i32, i32
  }
}

</mosaic_0001>

<bundles_post_ra>
// kernel: gt_bce_dice_loss.1
= control target key start
LH: loop header
LB: loop body
LE: loop exit
PB: predicated region body
PF: predicated region fallthrough
CT: control target
= control target key end

     0   :  { %vm131_vm0 = vcmask 1041408   ;;  %vm109_vm6 = vcmask 1024   ;;  %s608_s3 = inlined_call_operand.vmem [shape: f32[2,256], index: 3, kind: input, shape index: {}]   ;;  %s609_s0 = inlined_call_operand.vmem [shape: f32[2,256], index: 0, kind: input, shape index: {}]   ;;  %s610_s1 = inlined_call_operand.vmem [shape: f32[2,256], index: 1, kind: input, shape index: {}]   ;;  %s611_s2 = inlined_call_operand.vmem [shape: f32[2,256], index: 2, kind: input, shape index: {}]   ;;  %s612_s4 = inlined_call_operand.vmem [shape: f32[1,3,4,2,1], index: 4, kind: output, shape index: {}]  }
   0x1   :  { %v440_v0 = vld [vmem:[%s608_s3] sm:$0xf] }
   0x2   :  { %v140_v1 = vld [vmem:[%s609_s0] sm:$0xf]  ;;  %126 = vst [vmem:[#allocation1] ss:$4 sm:$0xff] %v440_v0 }
   0x3   :  { %v141_v2 = vand.u32 2147483647, %v140_v1  ;;  %v449_v4 = vld [vmem:[%s610_s1] sm:$0xf]  ;;  %v145_v18 = vmax.f32 %v140_v1, 0.0  ;;  %v146_v19 = vmul.f32 %v140_v1, %v440_v0  ;;  %vm160_vm2 = vcmp.ge.f32.partialorder %v140_v1, 0.0 }
   0x4   :  { %v209_v6 = vand.u32 2147483647, %v449_v4  ;;  %v458_v30 = vld [vmem:[%s611_s2] sm:$0xf]  ;;  %v213_v46 = vmax.f32 %v449_v4, 0.0  ;;  %v214_v47 = vmul.f32 %v449_v4, %v440_v0  ;;  %vm228_vm4 = vcmp.ge.f32.partialorder %v449_v4, 0.0 }
   0x5   :  { %v142_v3 = vsub.f32 0.0, %v141_v2  ;;  %v147_v23 = vsub.f32 %v145_v18, %v146_v19  ;;  %v278_v33 = vand.u32 2147483647, %v458_v30  ;;  %vm297_vm7 = vcmp.ge.f32.partialorder %v458_v30, 0.0 }
   0x6   :  { %v210_v12 = vsub.f32 0.0, %v209_v6  ;;  %v215_v52 = vsub.f32 %v213_v46, %v214_v47 }
   0x7   :  { %v143_v5 = vmul.f32 1.442695, %v142_v3  ;;  %v279_v36 = vsub.f32 0.0, %v278_v33 }
   0x8   :  { %v211_v16 = vmul.f32 1.442695, %v210_v12 }
   0x9   :  { %393 = vpow2.f32 %v143_v5  ;;  %v127_v7 = vld.sshfl [vmem:[#allocation1] sm:$0xff pattern:$0x73625140]  ;;  %v128_v8 = vld.sshfl [vmem:[#allocation1 + $0x8] sm:$0xff pattern:$0x73625140] }
   0xa   :  { %v132_v9 = vsel %vm131_vm0, %v127_v7, 0.0  ;;  %v133_v10 = vsel %vm131_vm0, %v128_v8, 0.0  ;;  %v280_v45 = vmul.f32 1.442695, %v279_v36 }
   0xb   :  { %v134_v11 = vadd.f32 %v133_v10, %v132_v9 }
   0xd   :  { %135 = vadd.xlane.f32.xlu0 %v134_v11 }
   0xf   :  { %v394_v13 = vpop.eup %393 }
  0x10   :  { %v148_v14 = vadd.f32 1.0, %v394_v13  ;;  %v151_v15 = vmul.f32 -0.5, %v394_v13  ;;  %v154_v20 = vand.u32 2147483647, %v394_v13 }
  0x12   :  { %395 = vlog2.f32 %v148_v14  ;;  %v152_v17 = vadd.f32 1.0, %v151_v15  ;;  %vm155_vm1 = vcmp.lt.f32.partialorder %v154_v20, 0.0004427343  ;;  %v282_v15 = vmax.f32 %v458_v30, 0.0 }
  0x13   :  { %397 = vrcp.f32 %v148_v14 }
  0x14   :  { %399 = vpow2.f32 %v211_v16  ;;  %v153_v21 = vmul.f32 %v394_v13, %v152_v17  ;;  %v283_v16 = vmul.f32 %v458_v30, %v440_v0 }
  0x18   :  { %v396_v22 = vpop.eup %395 }
  0x19   :  { %v398_v24 = vpop.eup %397  ;;  %v150_v25 = vmul.f32 0.6931472, %v396_v22 }
  0x1a   :  { %v400_v26 = vpop.eup %399  ;;  %v161_v28 = vmul.f32 %v398_v24, %v394_v13 }
  0x1b   :  { %v156_v27 = vsel %vm155_vm1, %v153_v21, %v150_v25  ;;  %v216_v31 = vadd.f32 1.0, %v400_v26  ;;  %v219_v35 = vmul.f32 -0.5, %v400_v26  ;;  %v222_v44 = vand.u32 2147483647, %v400_v26 }
  0x1c   :  { %v157_v29 = vadd.f32 %v156_v27, %v147_v23  ;;  %v162_v32 = vsel %vm160_vm2, %v398_v24, %v161_v28  ;;  %v284_v21 = vsub.f32 %v282_v15, %v283_v16  ;;  %v411_v28 = vmov 0.0  }
  0x1d   :  { %v179_v34 = vmul.f32 %v162_v32, %v440_v0  ;;  %401 = vlog2.f32 %v216_v31  ;;  %v220_v41 = vadd.f32 1.0, %v219_v35  ;;  %vm223_vm3 = vcmp.lt.f32.partialorder %v222_v44, 0.0004427343  ;;  %113 = vst.msk [vmem:[%s612_s4 + $0x6] sm:$0x3] %vm109_vm6, %v411_v28 }
  0x1e   :  { %165 = vst [vmem:[#allocation1] ss:$4 sm:$0xff] %v157_v29  ;;  %403 = vrcp.f32 %v216_v31 }
  0x1f   :  { %v221_v49 = vmul.f32 %v400_v26, %v220_v41  ;;  %405 = vpow2.f32 %v280_v45  ;;  %117 = vst.msk [vmem:[%s612_s4 + $0xe] sm:$0x3] %vm109_vm6, %v411_v28 }
  0x20   :  { %121 = vst.msk [vmem:[%s612_s4 + $0x16] sm:$0x3] %vm109_vm6, %v411_v28 }
  0x21   :  { %110 = vst.msk [vmem:[%s612_s4] sm:$0x3] %vm109_vm6, %v411_v28 }
  0x22   :  { %111 = vst.msk [vmem:[%s612_s4 + $0x2] sm:$0x3] %vm109_vm6, %v411_v28 }
  0x23   :  { %v402_v43 = vpop.eup %401  ;;  %112 = vst.msk [vmem:[%s612_s4 + $0x4] sm:$0x3] %vm109_vm6, %v411_v28 }
  0x24   :  { %v218_v48 = vmul.f32 0.6931472, %v402_v43  ;;  %v404_v57 = vpop.eup %403  ;;  %114 = vst.msk [vmem:[%s612_s4 + $0x8] sm:$0x3] %vm109_vm6, %v411_v28 }
  0x25   :  { %v166_v37 = vld.sshfl [vmem:[#allocation1] sm:$0xff pattern:$0x73625140]  ;;  %v167_v38 = vld.sshfl [vmem:[#allocation1 + $0x8] sm:$0xff pattern:$0x73625140]  ;;  %v406_v59 = vpop.eup %405  ;;  %v229_v60 = vmul.f32 %v404_v57, %v400_v26 }
  0x26   :  { %181 = vst [vmem:[#allocation1] ss:$4 sm:$0xff] %v179_v34  ;;  %v170_v39 = vsel %vm131_vm0, %v166_v37, 0.0  ;;  %v171_v40 = vsel %vm131_vm0, %v167_v38, 0.0  ;;  %v224_v55 = vsel %vm223_vm3, %v221_v49, %v218_v48  ;;  %v285_v63 = vadd.f32 1.0, %v406_v59 }
  0x27   :  { %v172_v42 = vadd.f32 %v171_v40, %v170_v39  ;;  %v225_v58 = vadd.f32 %v224_v55, %v215_v52  ;;  %v230_v3 = vsel %vm228_vm4, %v404_v57, %v229_v60  ;;  %v288_v7 = vmul.f32 -0.5, %v406_v59  ;;  %115 = vst.msk [vmem:[%s612_s4 + $0xa] sm:$0x3] %vm109_vm6, %v411_v28 }
  0x28   :  { %v248_v6 = vmul.f32 %v230_v3, %v440_v0  ;;  %407 = vlog2.f32 %v285_v63  ;;  %v291_v14 = vand.u32 2147483647, %v406_v59  ;;  %116 = vst.msk [vmem:[%s612_s4 + $0xc] sm:$0x3] %vm109_vm6, %v411_v28 }
  0x29   :  { %173 = vadd.xlane.f32.xlu0 %v172_v42  ;;  %v289_v11 = vadd.f32 1.0, %v288_v7  ;;  %409 = vrcp.f32 %v285_v63  ;;  %118 = vst.msk [vmem:[%s612_s4 + $0x10] sm:$0x3] %vm109_vm6, %v411_v28  ;;  %v376_v57 = vld [vmem:[%s612_s4 + $0x2] sm:$0x3] }
  0x2a   :  { %vm292_vm5 = vcmp.lt.f32.partialorder %v291_v14, 0.0004427343  ;;  %119 = vst.msk [vmem:[%s612_s4 + $0x12] sm:$0x3] %vm109_vm6, %v411_v28  ;;  %v378_v60 = vld [vmem:[%s612_s4 + $0x4] sm:$0x3] }
  0x2b   :  { %v290_v18 = vmul.f32 %v406_v59, %v289_v11  ;;  %120 = vst.msk [vmem:[%s612_s4 + $0x14] sm:$0x3] %vm109_vm6, %v411_v28  ;;  %v380_v63 = vld [vmem:[%s612_s4 + $0x8] sm:$0x3] }
  0x2d   :  { %v182_v50 = vld.sshfl [vmem:[#allocation1] sm:$0xff pattern:$0x73625140]  ;;  %v183_v51 = vld.sshfl [vmem:[#allocation1 + $0x8] sm:$0xff pattern:$0x73625140] }
  0x2e   :  { %196 = vst [vmem:[#allocation1] ss:$4 sm:$0xff] %v162_v32  ;;  %v186_v53 = vsel %vm131_vm0, %v182_v50, 0.0  ;;  %v187_v54 = vsel %vm131_vm0, %v183_v51, 0.0  ;;  %v408_v13 = vpop.eup %407  ;;  %v374_v51 = vld [vmem:[%s612_s4 + $0x6] sm:$0x3] }
  0x2f   :  { %v188_v56 = vadd.f32 %v187_v54, %v186_v53  ;;  %v287_v17 = vmul.f32 0.6931472, %v408_v13  ;;  %v410_v26 = vpop.eup %409  ;;  %v163_v54 = vld [vmem:[%s612_s4] sm:$0x3]  ;;  %v384_v7 = vld [vmem:[%s612_s4 + $0xc] sm:$0x3] }
  0x30   :  { %v298_v29 = vmul.f32 %v410_v26, %v406_v59 }
  0x31   :  { %189 = vadd.xlane.f32.xlu1 %v188_v56  ;;  %v293_v24 = vsel %vm292_vm5, %v290_v18, %v287_v17 }
  0x32   :  { %v294_v27 = vadd.f32 %v293_v24, %v284_v21  ;;  %v299_v35 = vsel %vm297_vm7, %v410_v26, %v298_v29  ;;  %v390_v15 = vld [vmem:[%s612_s4 + $0x14] sm:$0x3] }
  0x33   :  { %v317_v30 = vmul.f32 %v299_v35, %v440_v0 }
  0x35   :  { %v197_v61 = vld.sshfl [vmem:[#allocation1] sm:$0xff pattern:$0x73625140]  ;;  %v198_v62 = vld.sshfl [vmem:[#allocation1 + $0x8] sm:$0xff pattern:$0x73625140] }
  0x36   :  { %234 = vst [vmem:[#allocation1] ss:$4 sm:$0xff] %v225_v58  ;;  %v201_v1 = vsel %vm131_vm0, %v197_v61, 0.0  ;;  %v202_v2 = vsel %vm131_vm0, %v198_v62, 0.0 }
  0x37   :  { %v203_v5 = vadd.f32 %v202_v2, %v201_v1 }
  0x39   :  { %204 = vadd.xlane.f32.xlu1 %v203_v5 }
  0x3d   :  { %v235_v8 = vld.sshfl [vmem:[#allocation1] sm:$0xff pattern:$0x73625140]  ;;  %v236_v9 = vld.sshfl [vmem:[#allocation1 + $0x8] sm:$0xff pattern:$0x73625140] }
  0x3e   :  { %v239_v10 = vsel %vm131_vm0, %v235_v8, 0.0  ;;  %v240_v4 = vsel %vm131_vm0, %v236_v9, 0.0  ;;  %250 = vst [vmem:[#allocation1] ss:$4 sm:$0xff] %v248_v6 }
  0x3f   :  { %v241_v12 = vadd.f32 %v240_v4, %v239_v10  ;;  %v386_v10 = vld [vmem:[%s612_s4 + $0x10] sm:$0x3] }
  0x41   :  { %242 = vadd.xlane.f32.xlu2 %v241_v12  ;;  %v388_v12 = vld [vmem:[%s612_s4 + $0x12] sm:$0x3] }
  0x45   :  { %v251_v19 = vld.sshfl [vmem:[#allocation1] sm:$0xff pattern:$0x73625140]  ;;  %v252_v20 = vld.sshfl [vmem:[#allocation1 + $0x8] sm:$0xff pattern:$0x73625140] }
  0x46   :  { %v255_v22 = vsel %vm131_vm0, %v251_v19, 0.0  ;;  %v256_v23 = vsel %vm131_vm0, %v252_v20, 0.0  ;;  %265 = vst [vmem:[#allocation1] ss:$4 sm:$0xff] %v230_v3  ;;  %v382_v3 = vld [vmem:[%s612_s4 + $0xa] sm:$0x3] }
  0x47   :  { %v257_v25 = vadd.f32 %v256_v23, %v255_v22 }
  0x49   :  { %258 = vadd.xlane.f32.xlu2 %v257_v25 }
  0x4d   :  { %v266_v31 = vld.sshfl [vmem:[#allocation1] sm:$0xff pattern:$0x73625140]  ;;  %v267_v32 = vld.sshfl [vmem:[#allocation1 + $0x8] sm:$0xff pattern:$0x73625140] }
  0x4e   :  { %v270_v33 = vsel %vm131_vm0, %v266_v31, 0.0  ;;  %v271_v34 = vsel %vm131_vm0, %v267_v32, 0.0  ;;  %303 = vst [vmem:[#allocation1] ss:$4 sm:$0xff] %v294_v27 }
  0x4f   :  { %v272_v36 = vadd.f32 %v271_v34, %v270_v33 }
  0x51   :  { %273 = vadd.xlane.f32.xlu0 %v272_v36 }
  0x55   :  { %v304_v37 = vld.sshfl [vmem:[#allocation1] sm:$0xff pattern:$0x73625140]  ;;  %v305_v38 = vld.sshfl [vmem:[#allocation1 + $0x8] sm:$0xff pattern:$0x73625140] }
  0x56   :  { %319 = vst [vmem:[#allocation1] ss:$4 sm:$0xff] %v317_v30  ;;  %v308_v0 = vsel %vm131_vm0, %v304_v37, 0.0  ;;  %v309_v39 = vsel %vm131_vm0, %v305_v38, 0.0 }
  0x57   :  { %v310_v40 = vadd.f32 %v309_v39, %v308_v0 }
  0x59   :  { %311 = vadd.xlane.f32.xlu1 %v310_v40 }
  0x5d   :  { %v320_v41 = vld.sshfl [vmem:[#allocation1] sm:$0xff pattern:$0x73625140]  ;;  %v321_v42 = vld.sshfl [vmem:[#allocation1 + $0x8] sm:$0xff pattern:$0x73625140] }
  0x5e   :  { %v324_v43 = vsel %vm131_vm0, %v320_v41, 0.0  ;;  %v325_v44 = vsel %vm131_vm0, %v321_v42, 0.0  ;;  %334 = vst [vmem:[#allocation1] ss:$4 sm:$0xff] %v299_v35 }
  0x5f   :  { %v326_v45 = vadd.f32 %v325_v44, %v324_v43 }
  0x61   :  { %327 = vadd.xlane.f32.xlu2 %v326_v45 }
  0x65   :  { %v335_v46 = vld.sshfl [vmem:[#allocation1] sm:$0xff pattern:$0x73625140]  ;;  %v336_v47 = vld.sshfl [vmem:[#allocation1 + $0x8] sm:$0xff pattern:$0x73625140] }
  0x66   :  { %v339_v48 = vsel %vm131_vm0, %v335_v46, 0.0  ;;  %v340_v49 = vsel %vm131_vm0, %v336_v47, 0.0 }
  0x67   :  { %v341_v50 = vadd.f32 %v340_v49, %v339_v48 }
  0x69   :  { %342 = vadd.xlane.f32.xlu0 %v341_v50 }
  0x80   :  { %v136_v52 = vpop.xlane.xlu0 %135 }
  0x81   :  { %v137_v53 = vadd.f32 %v374_v51, %v136_v52 }
  0x83   :  { %375 = vst.msk [vmem:[%s612_s4 + $0x6] sm:$0x3] %vm109_vm6, %v137_v53 }
  0x9c   :  { %v174_v55 = vpop.xlane.xlu0 %173 }
  0x9d   :  { %v175_v56 = vadd.f32 %v174_v55, %v163_v54 }
  0x9f   :  { %176 = vst.msk [vmem:[%s612_s4] sm:$0x3] %vm109_vm6, %v175_v56 }
  0xa4   :  { %v190_v58 = vpop.xlane.xlu1 %189 }
  0xa5   :  { %v191_v59 = vadd.f32 %v376_v57, %v190_v58 }
  0xa7   :  { %377 = vst.msk [vmem:[%s612_s4 + $0x2] sm:$0x3] %vm109_vm6, %v191_v59 }
  0xac   :  { %v205_v61 = vpop.xlane.xlu1 %204 }
  0xad   :  { %v206_v62 = vadd.f32 %v378_v60, %v205_v61 }
  0xaf   :  { %379 = vst.msk [vmem:[%s612_s4 + $0x4] sm:$0x3] %vm109_vm6, %v206_v62 }
  0xb4   :  { %v243_v1 = vpop.xlane.xlu2 %242 }
  0xb5   :  { %v244_v2 = vadd.f32 %v380_v63, %v243_v1 }
  0xb7   :  { %381 = vst.msk [vmem:[%s612_s4 + $0x8] sm:$0x3] %vm109_vm6, %v244_v2 }
  0xbc   :  { %v259_v5 = vpop.xlane.xlu2 %258 }
  0xbd   :  { %v260_v6 = vadd.f32 %v382_v3, %v259_v5 }
  0xbf   :  { %383 = vst.msk [vmem:[%s612_s4 + $0xa] sm:$0x3] %vm109_vm6, %v260_v6 }
  0xc4   :  { %v274_v8 = vpop.xlane.xlu0 %273 }
  0xc5   :  { %v275_v9 = vadd.f32 %v384_v7, %v274_v8 }
  0xc7   :  { %385 = vst.msk [vmem:[%s612_s4 + $0xc] sm:$0x3] %vm109_vm6, %v275_v9 }
  0xcc   :  { %v312_v4 = vpop.xlane.xlu1 %311 }
  0xcd   :  { %v313_v11 = vadd.f32 %v386_v10, %v312_v4 }
  0xcf   :  { %387 = vst.msk [vmem:[%s612_s4 + $0x10] sm:$0x3] %vm109_vm6, %v313_v11 }
  0xd4   :  { %v328_v13 = vpop.xlane.xlu2 %327 }
  0xd5   :  { %v329_v14 = vadd.f32 %v388_v12, %v328_v13 }
  0xd7   :  { %389 = vst.msk [vmem:[%s612_s4 + $0x12] sm:$0x3] %vm109_vm6, %v329_v14 }
  0xdc   :  { %v343_v16 = vpop.xlane.xlu0 %342 }
  0xdd   :  { %v344_v17 = vadd.f32 %v390_v15, %v343_v16 }
  0xdf   :  { %391 = vst.msk [vmem:[%s612_s4 + $0x14] sm:$0x3] %vm109_vm6, %v344_v17 }

</bundles_post_ra>
